<compile_context>
chip_gen: v5e
topology: v5e:2x2
jax: 0.10.0
libtpu: 0.0.40
codegen_flags: <defaults>
</compile_context>

<pallas_src>
import functools

import jax
import jax.numpy as jnp
from jax import lax
from jax.experimental import pallas as pl
from jax.experimental.pallas import tpu as pltpu


def _msa_kernel(x_ref, w_ref, b_ref, o_ref, *, n_heads, d_head):
    d = n_heads * d_head
    x = x_ref[0]                                   # (N, d)

    # Fused QKV projection: one MXU matmul, f32 accumulation.
    # Scale 1/sqrt(d_head) is already folded into the q columns of w/b on the host.
    qkv = jnp.dot(x, w_ref[...], preferred_element_type=jnp.float32) + b_ref[...]  # (N, 3d)

    head_outs = []
    for h in range(n_heads):                       # static unroll over heads (small)
        lo = h * d_head
        hi = lo + d_head
        qh = qkv[:, lo:hi]                         # (N, d_head)  (already scaled)
        kh = qkv[:, d + lo:d + hi]                 # (N, d_head)
        vh = qkv[:, 2 * d + lo:2 * d + hi]         # (N, d_head)

        # q @ k.T without materializing a transpose.
        s = lax.dot_general(qh, kh, (((1,), (1,)), ((), ())),
                            preferred_element_type=jnp.float32)     # (N, N)

        # numerically-stable softmax along last dim
        s = s - jnp.max(s, axis=-1, keepdims=True)
        p = jnp.exp(s)
        p = p * pl.reciprocal(jnp.sum(p, axis=-1, keepdims=True), approx=True)

        head_outs.append(jnp.dot(p, vh, preferred_element_type=jnp.float32))

    # Single lane-dense (N, d) store per batch.
    o_ref[0] = jnp.concatenate(head_outs, axis=-1).astype(o_ref.dtype)


def _pack_qkv(wq, bq, wk, bk, wv, bv, *, scale):
    """Pack per-head nn.Linear params (y = x @ W.T + b) into one fused (d, 3d) matrix.

    Block-diagonal so that head h only reads its own d_head input columns, and the
    softmax scale is folded into the q weights/bias.
    """
    n_heads, d_head, _ = wq.shape

    def blockdiag_t(w_stack):
        return jax.scipy.linalg.block_diag(*[w_stack[h].T for h in range(n_heads)])

    wq_f = blockdiag_t(wq) * scale                 # (d, d)
    wk_f = blockdiag_t(wk)
    wv_f = blockdiag_t(wv)
    w_qkv = jnp.concatenate([wq_f, wk_f, wv_f], axis=1)                    # (d, 3d)
    b_qkv = jnp.concatenate([bq.reshape(-1) * scale,
                             bk.reshape(-1),
                             bv.reshape(-1)])[None, :]                     # (1, 3d)
    return w_qkv, b_qkv


def msa_forward(x, wq, bq, wk, bk, wv, bv, *, n_heads):
    """x: (B, N, d) float32.  Returns (B, N, d), matching the PyTorch MSA.forward."""
    B, N, d = x.shape
    assert d % n_heads == 0
    d_head = d // n_heads
    scale = 1.0 / (float(d_head) ** 0.5)

    w_qkv, b_qkv = _pack_qkv(wq, bq, wk, bk, wv, bv, scale=scale)

    kernel = functools.partial(_msa_kernel, n_heads=n_heads, d_head=d_head)

    # Rough per-step VMEM budget: double-buffered x/out blocks, resident weights, and
    # compiler temporaries (qkv, per-head scores/probs).  Clamp to a range that is
    # safe on v5e/v6e (128 MiB physical) and v7x (64 MiB physical).
    f32 = 4
    vmem_est = f32 * (4 * N * d                      # x + out, double-buffered
                      + 2 * (3 * d * d + 3 * d)      # fused weights + bias
                      + 3 * N * d                    # qkv
                      + 2 * N * N                    # scores + probs (one head live)
                      + 2 * N * d)                   # head outputs / concat
    vmem_bytes = int(min(max(vmem_est * 2, 16 * 1024 * 1024), 48 * 1024 * 1024))

    out = pl.pallas_call(
        kernel,
        out_shape=jax.ShapeDtypeStruct((B, N, d), x.dtype),
        grid_spec=pltpu.PrefetchScalarGridSpec(
            num_scalar_prefetch=0,
            grid=(B,),
            in_specs=[
                pl.BlockSpec((1, N, d), lambda b: (b, 0, 0)),        # x
                pl.BlockSpec((d, 3 * d), lambda b: (0, 0)),          # fused W (resident)
                pl.BlockSpec((1, 3 * d), lambda b: (0, 0)),          # fused bias (resident)
            ],
            out_specs=pl.BlockSpec((1, N, d), lambda b: (b, 0, 0)),  # lane-dense (N, d) slab
        ),
        compiler_params=pltpu.CompilerParams(
            dimension_semantics=("parallel",),
            vmem_limit_bytes=vmem_bytes),
    )(x, w_qkv, b_qkv)

    return out


def msa_reference(x, wq, bq, wk, bk, wv, bv, *, n_heads):
    """Pure-JAX reference mirroring the PyTorch loop semantics."""
    B, N, d = x.shape
    d_head = d // n_heads
    outs = []
    for b in range(B):
        head_outs = []
        for h in range(n_heads):
            seq = x[b, :, h * d_head:(h + 1) * d_head]
            q = seq @ wq[h].T + bq[h]
            k = seq @ wk[h].T + bk[h]
            v = seq @ wv[h].T + bv[h]
            att = jax.nn.softmax(q @ k.T / (d_head ** 0.5), axis=-1)
            head_outs.append(att @ v)
        outs.append(jnp.concatenate(head_outs, axis=-1))
    return jnp.stack(outs, axis=0)


if __name__ == "__main__":
    # Small shapes consistent with the module: d divisible by n_heads.
    B, N, d, n_heads = 2, 8, 32, 2
    d_head = d // n_heads

    key = jax.random.PRNGKey(0)
    kx, kwq, kbq, kwk, kbk, kwv, kbv = jax.random.split(key, 7)

    x = jax.random.normal(kx, (B, N, d), dtype=jnp.float32)

    # Deterministic parameter init (per-head stacked nn.Linear params).
    wq = 0.1 * jax.random.normal(kwq, (n_heads, d_head, d_head), dtype=jnp.float32)
    bq = 0.1 * jax.random.normal(kbq, (n_heads, d_head), dtype=jnp.float32)
    wk = 0.1 * jax.random.normal(kwk, (n_heads, d_head, d_head), dtype=jnp.float32)
    bk = 0.1 * jax.random.normal(kbk, (n_heads, d_head), dtype=jnp.float32)
    wv = 0.1 * jax.random.normal(kwv, (n_heads, d_head, d_head), dtype=jnp.float32)
    bv = 0.1 * jax.random.normal(kbv, (n_heads, d_head), dtype=jnp.float32)

    out = msa_forward(x, wq, bq, wk, bk, wv, bv, n_heads=n_heads)
    out = jax.block_until_ready(out)

    ref = msa_reference(x, wq, bq, wk, bk, wv, bv, n_heads=n_heads)
    assert out.shape == (B, N, d)
    # Slightly loosened tolerance for pl.reciprocal(approx=True) in the softmax denom.
    assert jnp.allclose(out, ref, atol=2e-3, rtol=2e-3), "mismatch vs reference"

    print("KERNEL_OK")
</pallas_src>

<mosaic_0001>
module attributes {stable_mosaic.version = 11 : i64} {
  func.func @_msa_kernel(%arg0: i32, %arg1: memref<1x8x32xf32, #tpu.memory_space<vmem>>, %arg2: memref<32x96xf32, #tpu.memory_space<vmem>>, %arg3: memref<1x96xf32, #tpu.memory_space<vmem>>, %arg4: memref<1x8x32xf32, #tpu.memory_space<vmem>>) attributes {dimension_semantics = [#tpu.dimension_semantics<parallel>], iteration_bounds = array<i64: 2>, scalar_prefetch = 0 : i64, scratch_operands = 0 : i64, tpu.core_type = #tpu.core_type<tc>, window_params = [{transform_indices = @transform_0, window_bounds = array<i64: 1, 8, 32>}, {pipeline_mode = #tpu.pipeline_mode<synchronous>, transform_indices = @transform_1, window_bounds = array<i64: 32, 96>}, {pipeline_mode = #tpu.pipeline_mode<synchronous>, transform_indices = @transform_2, window_bounds = array<i64: 1, 96>}, {transform_indices = @transform_3, window_bounds = array<i64: 1, 8, 32>}]} {
    %c0 = arith.constant 0 : index
    %c0_0 = arith.constant 0 : index
    %c0_1 = arith.constant 0 : index
    %0 = vector.load %arg1[%c0, %c0_0, %c0_1] : memref<1x8x32xf32, #tpu.memory_space<vmem>>, vector<1x8x32xf32>
    %1 = vector.shape_cast %0 : vector<1x8x32xf32> to vector<8x32xf32>
    %c0_2 = arith.constant 0 : index
    %c0_3 = arith.constant 0 : index
    %2 = vector.load %arg2[%c0_2, %c0_3] : memref<32x96xf32, #tpu.memory_space<vmem>>, vector<32x96xf32>
    %cst = arith.constant dense<0.000000e+00> : vector<8x96xf32>
    %3 = tpu.matmul %1, %2, %cst {dimension_numbers = #tpu.dot_dimension_numbers<[1], [0], [0], [1], [0, 0, 1, 1], [], []>} : vector<8x32xf32>, vector<32x96xf32>, vector<8x96xf32> -> vector<8x96xf32>
    %c0_4 = arith.constant 0 : index
    %c0_5 = arith.constant 0 : index
    %4 = vector.load %arg3[%c0_4, %c0_5] : memref<1x96xf32, #tpu.memory_space<vmem>>, vector<1x96xf32>
    %5 = vector.broadcast %4 : vector<1x96xf32> to vector<8x96xf32>
    %6 = arith.addf %3, %5 : vector<8x96xf32>
    %7 = vector.extract_strided_slice %6 {offsets = [0, 0], sizes = [8, 16], strides = [1, 1]} : vector<8x96xf32> to vector<8x16xf32>
    %8 = vector.extract_strided_slice %6 {offsets = [0, 32], sizes = [8, 16], strides = [1, 1]} : vector<8x96xf32> to vector<8x16xf32>
    %9 = vector.extract_strided_slice %6 {offsets = [0, 64], sizes = [8, 16], strides = [1, 1]} : vector<8x96xf32> to vector<8x16xf32>
    %cst_6 = arith.constant dense<0.000000e+00> : vector<8x8xf32>
    %10 = tpu.matmul %7, %8, %cst_6 {dimension_numbers = #tpu.dot_dimension_numbers<[1], [1], [0], [0], [0, 0, 1, 0], [], []>} : vector<8x16xf32>, vector<8x16xf32>, vector<8x8xf32> -> vector<8x8xf32>
    %cst_7 = arith.constant dense<0xFF800000> : vector<8xf32>
    %11 = vector.multi_reduction <maximumf>, %10, %cst_7 [1] : vector<8x8xf32> to vector<8xf32>
    %12 = vector.shape_cast %11 : vector<8xf32> to vector<8x1xf32>
    %13 = vector.broadcast %12 : vector<8x1xf32> to vector<8x8xf32>
    %14 = arith.subf %10, %13 : vector<8x8xf32>
    %15 = math.exp %14 : vector<8x8xf32>
    %cst_8 = arith.constant dense<0.000000e+00> : vector<8xf32>
    %16 = vector.multi_reduction <add>, %15, %cst_8 [1] : vector<8x8xf32> to vector<8xf32>
    %17 = vector.shape_cast %16 : vector<8xf32> to vector<8x1xf32>
    %18 = tpu.reciprocal %17 {approx = true} : vector<8x1xf32> -> vector<8x1xf32>
    %19 = vector.broadcast %18 : vector<8x1xf32> to vector<8x8xf32>
    %20 = arith.mulf %15, %19 : vector<8x8xf32>
    %cst_9 = arith.constant dense<0.000000e+00> : vector<8x16xf32>
    %21 = tpu.matmul %20, %9, %cst_9 {dimension_numbers = #tpu.dot_dimension_numbers<[1], [0], [0], [1], [0, 0, 1, 1], [], []>} : vector<8x8xf32>, vector<8x16xf32>, vector<8x16xf32> -> vector<8x16xf32>
    %22 = vector.extract_strided_slice %6 {offsets = [0, 16], sizes = [8, 16], strides = [1, 1]} : vector<8x96xf32> to vector<8x16xf32>
    %23 = vector.extract_strided_slice %6 {offsets = [0, 48], sizes = [8, 16], strides = [1, 1]} : vector<8x96xf32> to vector<8x16xf32>
    %24 = vector.extract_strided_slice %6 {offsets = [0, 80], sizes = [8, 16], strides = [1, 1]} : vector<8x96xf32> to vector<8x16xf32>
    %cst_10 = arith.constant dense<0.000000e+00> : vector<8x8xf32>
    %25 = tpu.matmul %22, %23, %cst_10 {dimension_numbers = #tpu.dot_dimension_numbers<[1], [1], [0], [0], [0, 0, 1, 0], [], []>} : vector<8x16xf32>, vector<8x16xf32>, vector<8x8xf32> -> vector<8x8xf32>
    %cst_11 = arith.constant dense<0xFF800000> : vector<8xf32>
    %26 = vector.multi_reduction <maximumf>, %25, %cst_11 [1] : vector<8x8xf32> to vector<8xf32>
    %27 = vector.shape_cast %26 : vector<8xf32> to vector<8x1xf32>
    %28 = vector.broadcast %27 : vector<8x1xf32> to vector<8x8xf32>
    %29 = arith.subf %25, %28 : vector<8x8xf32>
    %30 = math.exp %29 : vector<8x8xf32>
    %cst_12 = arith.constant dense<0.000000e+00> : vector<8xf32>
    %31 = vector.multi_reduction <add>, %30, %cst_12 [1] : vector<8x8xf32> to vector<8xf32>
    %32 = vector.shape_cast %31 : vector<8xf32> to vector<8x1xf32>
    %33 = tpu.reciprocal %32 {approx = true} : vector<8x1xf32> -> vector<8x1xf32>
    %34 = vector.broadcast %33 : vector<8x1xf32> to vector<8x8xf32>
    %35 = arith.mulf %30, %34 : vector<8x8xf32>
    %cst_13 = arith.constant dense<0.000000e+00> : vector<8x16xf32>
    %36 = tpu.matmul %35, %24, %cst_13 {dimension_numbers = #tpu.dot_dimension_numbers<[1], [0], [0], [1], [0, 0, 1, 1], [], []>} : vector<8x8xf32>, vector<8x16xf32>, vector<8x16xf32> -> vector<8x16xf32>
    %37 = tpu.concatenate %21, %36 in 1 : vector<8x16xf32>, vector<8x16xf32> -> vector<8x32xf32>
    %c0_14 = arith.constant 0 : index
    %c0_15 = arith.constant 0 : index
    %c0_16 = arith.constant 0 : index
    %38 = vector.load %arg4[%c0_14, %c0_15, %c0_16] : memref<1x8x32xf32, #tpu.memory_space<vmem>>, vector<1x8x32xf32>
    %39 = vector.shape_cast %38 : vector<1x8x32xf32> to vector<8x32xf32>
    %40 = vector.shape_cast %37 : vector<8x32xf32> to vector<1x8x32xf32>
    tpu.vector_store %arg4[%c0_14, %c0_15, %c0_16], %40 {strides = array<i32>} : memref<1x8x32xf32, #tpu.memory_space<vmem>>, vector<1x8x32xf32>,
    return
  }
  func.func @transform_0(%arg0: i32) -> (i32, i32, i32) {
    %c0_i32 = arith.constant 0 : i32
    %c0_i32_0 = arith.constant 0 : i32
    %c0_i32_1 = arith.constant 0 : i32
    return %arg0, %c0_i32, %c0_i32_0 : i32, i32, i32
  }
  func.func @transform_1(%arg0: i32) -> (i32, i32) {
    %c0_i32 = arith.constant 0 : i32
    %c0_i32_0 = arith.constant 0 : i32
    %c0_i32_1 = arith.constant 0 : i32
    return %c0_i32, %c0_i32_0 : i32, i32
  }
  func.func @transform_2(%arg0: i32) -> (i32, i32) {
    %c0_i32 = arith.constant 0 : i32
    %c0_i32_0 = arith.constant 0 : i32
    %c0_i32_1 = arith.constant 0 : i32
    return %c0_i32, %c0_i32_0 : i32, i32
  }
  func.func @transform_3(%arg0: i32) -> (i32, i32, i32) {
    %c0_i32 = arith.constant 0 : i32
    %c0_i32_0 = arith.constant 0 : i32
    %c0_i32_1 = arith.constant 0 : i32
    return %arg0, %c0_i32, %c0_i32_0 : i32, i32, i32
  }
}

</mosaic_0001>

<bundles_post_ra>
// kernel: tpu_custom_call.1
= control target key start
LH: loop header
LB: loop body
LE: loop exit
PB: predicated region body
PF: predicated region fallthrough
CT: control target
= control target key end

     0   :  { %8 = vsyncpa [#allocation3], 0  ;;  %s883_s0 = inlined_call_operand.hbm [shape: f32[2,8,32], index: 0, kind: input, shape index: {}]   ;;  %s884_s1 = inlined_call_operand.hbm [shape: f32[32,96], index: 1, kind: input, shape index: {}]   ;;  %s885_s2 = inlined_call_operand.vmem [shape: f32[1,96], index: 2, kind: input, shape index: {}]   ;;  %s886_s3 = inlined_call_operand.hbm [shape: f32[2,8,32], index: 3, kind: output, shape index: {}]  }
   0x1   :  { %10 = vsyncpa [#allocation3 + $0x1], 0 }
   0x2   :  { %11 = vsyncpa [#allocation6], 0 }
   0x3   :  { %12 = vsyncpa [#allocation4], 0 }
   0x4   :  { %14 = vsyncpa [#allocation4 + $0x1], 0  ;;  %s727_s12 = smov 0   ;;  %s729_s13 = smov 0  }
   0x5   :  { %s731_s14 = smov 0   ;;  %s733_s15 = smov 0  }
   0x6 LB: > { %s130_s18 = sshll.u32 %s884_s1, 4  ;;  %s751_s19 = sadd.s32 4294967295, %s696_s15   ;;  %s696_s15 = sphi %s733_s15, %s896_s15   ;;  %s692_s14 = sphi %s731_s14, %s895_s14   ;;  %s688_s13 = sphi %s729_s13, %s894_s13   ;;  %s684_s12 = sphi %s727_s12, %s893_s12   ;;  %s131_s18 = int_to_ptr.hbm [resolvable:$true] %s130_s18 }
   0x7   : > { %p472_p0 = scmp.ge.s32.totalorder %s696_s15, 1  ;;  %p41_p1 = scmp.eq.s32.totalorder %s751_s19, 0 }
   0x8   : > { %p119_p2 = scmp.lt.s32.totalorder %s696_s15, 3  ;;  %s698_s21 = smov [#allocation5]  }
   0x9   : > { %s132_s22 = sshll.u32 %s698_s21, 4  ;;  %s699_s23 = smov 128   ;;  %s133_s22 = int_to_ptr.vmem [resolvable:$true] %s132_s22 }
   0xa   : > { %p756_p3 = pnand %p472_p0, %p119_p2  ;;  %s700_s24 = smov 8  }
   0xb   : > { %s471_s25 = sadd.s32 4294967294, %s696_s15   ;;  %s767_s26 = sadd.s32 1, %s696_s15  }
   0xc   : > { %p500_p4 = pneg %p756_p3  ;;  %s27_s27 = sadd.s32 1, %s692_s14 }
   0xd   : > { %s24_s28 = ssub.s32 %s696_s15, %s767_s26  ;;  %p34_p7 = scmp.ne.s32.totalorder %s692_s14, %s688_s13 }
   0xe   : > { %p501_p6 = pnand %p500_p4, %p41_p1  ;;  %p25_p8 = scmp.eq.s32.totalorder %s24_s28, 0 }
   0xf   : > { %p35_p9 = scmp.eq.s32.totalorder %s696_s15, 0  ;;  %p40_p10 = scmp.ne.s32.totalorder %s688_s13, %s684_s12 }
  0x10   : > { %503 = dma.hbm_to_vmem [thread:$0]  (!%p501_p6), %s131_s18, 512, %s133_s22, [#allocation6], %s699_s23, %s699_s23, %s700_s24  }
  0x11   : > { %p106_p11 = scmp.eq.s32.totalorder %s751_s19, 1  ;;  %p783_p12 = por %p41_p1, %p40_p10 }
  0x12   : > { %s779_s29 = scalar_select %p25_p8, %s692_s14, %s27_s27  }
  0x13   : > { %p787_p13 = por %p106_p11, %p34_p7  ;;  %p112_p0 = scmp.eq.s32.totalorder %s471_s25, 1 }
  0x14   : > { %p36_p2 = por %p35_p9, %p34_p7  ;;  %s149_s5 = sand.u32 1, %s692_s14  }
  0x15   : > { %p792_p4 = por %p112_p0, %p40_p10  ;;  %p513_p6 = scmp.lt.s32.totalorder %s696_s15, 2 }
  0x16   : > { %s475_s7 = sshll.u32 %s149_s5, 3  ;;  %s476_s8 = sshll.u32 %s696_s15, 3 }
  0x17   : > { %s157_s11 = scalar_lea.hbm %s883_s0, %s476_s8  ;;  %s153_s17 = scalar_lea.vmem [#allocation2], %s475_s7 }
  0x18   : > { %s159_s16 = sshll.u32 %s157_s11, 4  ;;  %s161_s18 = sshll.u32 %s153_s17, 4  ;;  %s160_s16 = int_to_ptr.hbm [resolvable:$true] %s159_s16  ;;  %s162_s18 = int_to_ptr.vmem [resolvable:$true] %s161_s18 }
  0x19   : > { %p801_p8 = pnand %p513_p6, %p36_p2  ;;  %s150_s22 = scalar_lea.sflag [#allocation3], %s149_s5 }
  0x1a   : > { %s596_s23 = sshra.s32 %s160_s16, 4  ;;  %s603_s28 = scalar_lea.hbm %s883_s0, 16  ;;  %s597_s23 = int_to_ptr.hbm [resolvable:$true] %s596_s23 }
  0x1b   : > { %s598_s24 = scalar_lea.hbm %s597_s23, 8  ;;  %p600_p9 = pneg %p801_p8 }
  0x1c   : > { %p599_p7 = scmp.ne.s32.totalorder %s597_s23, %s598_s24  ;;  %p604_p0 = scmp.lt.s32.totalorder %s597_s23, %s883_s0 }
  0x1d   : > { %p605_p2 = scmp.lt.s32.totalorder %s603_s28, %s598_s24 }
  0x1e   : > { %p601_p10 = pnand %p600_p9, %p599_p7 }
  0x1f   : > { %p606_p6 = por %p605_p2, %p604_p0 }
  0x20   : > { %p602_p11 = pneg %p601_p10 }
  0x22   : > { %p607_p5 = pnand %p606_p6, %p602_p11 }
  0x24   : > { %610 = shalt.err (!%p607_p5)
}
  0x25   : > { %507 = dma.hbm_to_vmem [thread:$0]  (!%p801_p8), %s160_s16, 128, %s162_s18, %s150_s22  }
  0x26   : > { %170 = sbr.rel (%p756_p3) target bundleno = 921 (0x399), region = 32  ;;  %s818_s5 = sand.u32 (!%p756_p3), 1, %s688_s13  }
  0x27   : > { %s478_s9 = sshll.u32 (!%p756_p3), %s818_s5, 3  ;;  %s173_s10 = scalar_lea.sflag (!%p756_p3), [#allocation3], %s818_s5 }
  0x28   : > { %s176_s11 = scalar_lea.vmem (!%p756_p3), [#allocation2], %s478_s9 }
  0x2b   : > { %671 = dma.done.wait (%p783_p12), %s173_s10, 128  }
  0x2c   : > { %673 = vsyncadd (%p783_p12), %s173_s10, 4294967168 }
  0x2d   : > { %675 = dma.done.wait (%p41_p1), [#allocation6], 512  }
  0x2e   : > { %677 = vsyncadd (%p41_p1), [#allocation6], 4294966784  ;;  %v209_v0 = vld [vmem:[#allocation5 + $0x18] sm:$0xff]  ;;  %v208_v1 = vld [vmem:[#allocation5 + $0x10] sm:$0xff]  ;;  %vm214_vm0 = vcmask 261120   ;;  %s701_s16 = smov 112  }
  0x2f   : > { %230 = vmatpush.msra.mxu0 %v209_v0  ;;  %v207_v2 = vld [vmem:[#allocation5 + $0x8] sm:$0xff]  ;;  %v206_v3 = vld [vmem:[#allocation5] sm:$0xff]  ;;  %v205_v4 = vld [vmem:[%s176_s11] sm:$0xff]  ;;  %s702_s17 = smov 96   ;;  %s703_s18 = smov 80   ;;  %vm241_vm1 = vcmask 130048  }
  0x30   : > { %v557_v5 = vld [vmem:[%s885_s2] ss:$0 sm:$0xff]  ;;  %vm266_vm2 = vcmask 64512   ;;  %s704_s21 = smov 64   ;;  %s705_s22 = smov 48  }
  0x31   : > { %231 = vmatpush.msra.mxu0 %v208_v1  ;;  %s706_s23 = smov 16   ;;  %s489_s24 = sshll.u32 %s751_s19, 3 }
  0x32   : > { %s386_s28 = scalar_lea.hbm %s886_s3, %s489_s24  ;;  %s204_s7 = scalar_lea.vmem [#allocation7], %s478_s9 }
  0x33   : > { %232 = vmatpush.msra.mxu0 %v207_v2  ;;  %s388_s8 = sshll.u32 %s204_s7, 4  ;;  %s390_s10 = sshll.u32 %s386_s28, 4  ;;  %s389_s8 = int_to_ptr.vmem [resolvable:$true] %s388_s8  ;;  %s391_s10 = int_to_ptr.hbm [resolvable:$true] %s390_s10 }
  0x34   : > { %s376_s11 = scalar_lea.sflag [#allocation4], %s818_s5  ;;  %s640_s20 = sshra.s32 %s391_s10, 4  ;;  %s641_s20 = int_to_ptr.hbm [resolvable:$true] %s640_s20 }
  0x35   : > { %233 = vmatpush.msra.mxu0 %v206_v3  ;;  %s642_s30 = scalar_lea.hbm %s641_s20, 8  ;;  %s646_s9 = scalar_lea.hbm %s886_s3, 16 }
  0x36   : > { %481 = vmatmul.msk.f32.vlgmr.msra.gmra.mxu0 %vm214_vm0, %v205_v4  ;;  %p643_p1 = scmp.ne.s32.totalorder %s641_s20, %s642_s30  ;;  %p647_p12 = scmp.lt.s32.totalorder %s641_s20, %s886_s3 }
  0x37   : > { %p648_p8 = scmp.lt.s32.totalorder %s646_s9, %s642_s30 }
  0x38   : > { %p644_p3 = pnand %p643_p1, %p787_p13 }
  0x39   : > { %p649_p7 = por %p648_p8, %p647_p12 }
  0x3a   : > { %p645_p5 = pneg %p644_p3 }
  0x3c   : > { %p650_p9 = pnand %p649_p7, %p645_p5 }
  0xb3   : > { %v235_v6 = vpop.f32.mrf.mxu0 }
  0xb4   : > { %v236_v7 = vadd.f32 %v557_v5, %v235_v6 }
  0xb6   : > { %304 = vrot.lane.b32.xlu1 %v236_v7, %s701_s16  ;;  %239 = vrot.lane.b32.xlu0 %v236_v7, %s702_s17 }
  0xbe   : > { %306 = vrot.lane.b32.xlu0 %v236_v7, %s703_s18 }
 0x128   : > { %v240_v8 = vpop.permute.xlu0 %239  ;;  %v305_v10 = vpop.permute.xlu1 %304 }
 0x129   : > { %482 = vmatpush.xpose.msk.msra.mxu1 %vm241_vm1, %v240_v8 }
 0x12c   : > { %483 = vmatmul.msk.f32.vlgmr.msra.gmra.mxu1 %vm241_vm1, %v236_v7 }
 0x130   : > { %v307_v9 = vpop.permute.xlu0 %306 }
 0x131   : > { %485 = vmatpush.xpose.msk.msra.mxu3 %vm241_vm1, %v307_v9 }
 0x134   : > { %486 = vmatmul.msk.f32.vlgmr.msra.gmra.mxu3 %vm241_vm1, %v305_v10 }
 0x1a9   : > { %v263_v11 = vpop.f32.mrf.mxu1 }
 0x1aa   : > { %v267_v12 = vsel %vm266_vm2, %v263_v11, -inf }
 0x1ab   : > { %268 = vmax.xlane.f32.xlu1 %v267_v12 }
 0x1b7   : > { %v329_v13 = vpop.f32.mrf.mxu3 }
 0x1b8   : > { %v332_v14 = vsel %vm266_vm2, %v329_v13, -inf }
 0x1b9   : > { %333 = vmax.xlane.f32.xlu2 %v332_v14 }
 0x21e   : > { %v269_v15 = vpop.xlane.xlu1 %268 }
 0x21f   : > { %v270_v16 = vsub.f32 %v263_v11, %v269_v15 }
 0x221   : > { %v271_v17 = vmul.f32 1.442695, %v270_v16 }
 0x223   : > { %558 = vpow2.f32 %v271_v17 }
 0x229   : > { %v559_v18 = vpop.eup %558 }
 0x22a   : > { %v273_v19 = vsel %vm266_vm2, %v559_v18, 0.0 }
 0x22b   : > { %274 = vadd.xlane.f32.xlu2 %v273_v19 }
 0x22c   : > { %v334_v20 = vpop.xlane.xlu2 %333 }
 0x22d   : > { %v335_v21 = vsub.f32 %v329_v13, %v334_v20 }
 0x22f   : > { %v336_v22 = vmul.f32 1.442695, %v335_v21 }
 0x231   : > { %560 = vpow2.f32 %v336_v22 }
 0x237   : > { %v561_v23 = vpop.eup %560 }
 0x238   : > { %v338_v24 = vsel %vm266_vm2, %v561_v23, 0.0 }
 0x239   : > { %339 = vadd.xlane.f32.xlu0 %v338_v24 }
 0x243   : > { %278 = vrot.lane.b32.xlu2 %v236_v7, %s704_s21 }
 0x24b   : > { %343 = vrot.lane.b32.xlu2 %v236_v7, %s705_s22 }
 0x29e   : > { %v275_v25 = vpop.xlane.xlu2 %274 }
 0x29f   : > { %562 = vrcp.f32 %v275_v25 }
 0x2a5   : > { %v563_v26 = vpop.eup %562 }
 0x2a6   : > { %v279_v27 = vpop.permute.xlu2 %278  ;;  %v277_v28 = vmul.f32 %v563_v26, %v559_v18 }
 0x2a7   : > { %299 = vmatpush.msra.mxu2 %v279_v27 }
 0x2a8   : > { %484 = vmatmul.msk.f32.vlgmr.msra.gmra.mxu2 %vm266_vm2, %v277_v28 }
 0x2ac   : > { %v340_v29 = vpop.xlane.xlu0 %339 }
 0x2ad   : > { %564 = vrcp.f32 %v340_v29 }
 0x2ae   : > { %v344_v30 = vpop.permute.xlu2 %343 }
 0x2af   : > { %364 = vmatpush.msrb.mxu2 %v344_v30 }
 0x2b3   : > { %v565_v31 = vpop.eup %564 }
 0x2b4   : > { %v342_v32 = vmul.f32 %v565_v31, %v561_v23 }
 0x2b6   : > { %487 = vmatmul.msk.f32.vlgmr.msrb.gmra.mxu2 %vm266_vm2, %v342_v32 }
 0x32b   : > { %v301_v33 = vpop.f32.mrf.mxu2 }
 0x339   : > { %v366_v34 = vpop.f32.mrf.mxu2 }
 0x33a   : > { %370 = vrot.lane.b32.xlu2 %v366_v34, %s706_s23 }
 0x394   : > { %v371_v35 = vpop.permute.xlu2 %370 }
 0x395   : > { %v373_v36 = vsel %vm241_vm1, %v301_v33, %v371_v35 }
 0x396   : > { %374 = vst.msk [vmem:[%s204_s7] sm:$0xff] %vm214_vm0, %v373_v36 }
 0x397   : > { %653 = shalt.err (!%p650_p9)
}
 0x398   : > { %498 = dma.vmem_to_hbm [thread:$0]  (%p787_p13), %s389_s8, 128, %s391_s10, %s376_s11  }
 0x399 PF: > { %s402_s5 = sand.u32 1, %s684_s12   ;;  %p892_p10 = scmp.ge.s32.totalorder %s696_s15, 2 }
 0x39a   : > { %s403_s21 = scalar_lea.sflag [#allocation4], %s402_s5 }
 0x39b   : > { %p509_p11 = pnand %p892_p10, %p792_p4 }
 0x39d   : > { %p510_p0 = pneg %p509_p11 }
 0x39f   : > { %679 = dma.done.wait (%p510_p0), %s403_s21, 128  }
 0x3a0   : > { %681 = vsyncadd (%p510_p0), %s403_s21, 4294967168  ;;  %p17_p2 = scmp.ge.s32.totalorder %s767_s26, 4   ;;  %s893_s12 = smov %s688_s13 }
 0x3a1   : > { %s894_s13 = smov %s692_s14  ;;  %s895_s14 = smov %s779_s29 }
 0x3a2   : > { %s896_s15 = smov %s767_s26  ;;  %19 = sbr.rel (!%p17_p2) target bundleno = 6 (0x6), region = 81 }
 0x3a7   :  { %409 = vsyncpa [#allocation3], 1 }
 0x3a8   :  { %411 = vsyncpa [#allocation3 + $0x1], 1 }
 0x3a9   :  { %412 = vsyncpa [#allocation6], 1 }
 0x3aa   :  { %413 = vsyncpa [#allocation4], 1 }
 0x3ab   :  { %415 = vsyncpa [#allocation4 + $0x1], 1 }

</bundles_post_ra>
